<compile_context>
chip_gen: v7x
topology: tpu7x:2x2x1
jax: 0.10.0
libtpu: 0.0.40
codegen_flags: <defaults>
</compile_context>

<pallas_src>
import functools

import jax
import jax.numpy as jnp
from jax.experimental import pallas as pl
from jax.experimental.pallas import tpu as pltpu


def _ru8(n: int) -> int:
    """Round up to a multiple of 8 (sublane granularity)."""
    return ((n + 7) // 8) * 8


# ---------------------------------------------------------------------------
# Kernel
# ---------------------------------------------------------------------------
def policy_net_kernel(x_ref, p_ref, out_ref, *, S, H, A,
                      off_w1, off_b1, off_w2, off_b2):
    # x: (TB, S), p: packed params blob, out: (TB, A)
    x = x_ref[...]

    # Static (compile-time) slices into the packed parameter blob.
    w1 = p_ref[off_w1:off_w1 + S, 0:H]   # (S, H)
    b1 = p_ref[off_b1:off_b1 + 1, 0:H]   # (1, H)
    w2 = p_ref[off_w2:off_w2 + H, 0:A]   # (H, A)
    b2 = p_ref[off_b2:off_b2 + 1, 0:A]   # (1, A)

    # fc1 + ReLU  (MXU matmul, f32 accumulate)
    h = jnp.dot(x, w1, preferred_element_type=jnp.float32) + b1
    h = jnp.maximum(h, 0.0)

    # fc2
    logits = jnp.dot(h, w2, preferred_element_type=jnp.float32) + b2

    # numerically-stable softmax over the last (action) axis
    m = jnp.max(logits, axis=-1, keepdims=True)
    e = jnp.exp(logits - m)
    denom = jnp.sum(e, axis=-1, keepdims=True)
    out_ref[...] = (e * pl.reciprocal(denom, approx=True)).astype(out_ref.dtype)


# ---------------------------------------------------------------------------
# Parameter packing: one contiguous blob, each section aligned to 8 sublanes.
# ---------------------------------------------------------------------------
def pack_params(w1, b1, w2, b2):
    S, H = w1.shape
    _, A = w2.shape
    off_w1 = 0
    off_b1 = off_w1 + _ru8(S)
    off_w2 = off_b1 + 8
    off_b2 = off_w2 + _ru8(H)
    rows = off_b2 + 8
    width = max(H, A)

    blob = jnp.zeros((rows, width), jnp.float32)
    blob = blob.at[off_w1:off_w1 + S, 0:H].set(w1)
    blob = blob.at[off_b1, 0:H].set(jnp.reshape(b1, (H,)))
    blob = blob.at[off_w2:off_w2 + H, 0:A].set(w2)
    blob = blob.at[off_b2, 0:A].set(jnp.reshape(b2, (A,)))
    offsets = dict(off_w1=off_w1, off_b1=off_b1, off_w2=off_w2, off_b2=off_b2)
    return blob, offsets


# ---------------------------------------------------------------------------
# Wrapper
# ---------------------------------------------------------------------------
def policy_net_forward(x, params_blob, offsets, state_dim, hidden_dim, action_dim,
                       max_batch_tile=512):
    B, S = x.shape
    assert S == state_dim
    H, A = hidden_dim, action_dim

    # Batch tile: large (up to 512 rows) for DMA-pipeline efficiency, but no bigger
    # than the (8-aligned) batch itself. Pad batch to a multiple of the tile.
    TB = min(max_batch_tile, _ru8(B))
    B_pad = ((B + TB - 1) // TB) * TB
    if B_pad != B:
        x = jnp.pad(x, ((0, B_pad - B), (0, 0)))
    num_tiles = B_pad // TB

    kernel = functools.partial(policy_net_kernel, S=S, H=H, A=A, **offsets)

    out = pl.pallas_call(
        kernel,
        out_shape=jax.ShapeDtypeStruct((B_pad, A), jnp.float32),
        grid=(num_tiles,),
        in_specs=[
            pl.BlockSpec((TB, S), lambda i: (i, 0)),                  # batch-tiled x
            pl.BlockSpec(params_blob.shape, lambda i: (0, 0)),        # weights resident
        ],
        out_specs=pl.BlockSpec((TB, A), lambda i: (i, 0)),
        compiler_params=pltpu.CompilerParams(
            dimension_semantics=("parallel",),                        # megacore on v7x
        ),
    )(x, params_blob)

    return out[:B] if B_pad != B else out


def init_params(key, state_dim, hidden_dim, action_dim):
    """Deterministic PyTorch-Linear-style init: U(-1/sqrt(fan_in), 1/sqrt(fan_in))."""
    k1, k2, k3, k4 = jax.random.split(key, 4)
    bound1 = 1.0 / (state_dim ** 0.5)
    bound2 = 1.0 / (hidden_dim ** 0.5)
    # weights stored as (in, out) == transpose of PyTorch's (out, in)
    w1 = jax.random.uniform(k1, (state_dim, hidden_dim), jnp.float32, -bound1, bound1)
    b1 = jax.random.uniform(k2, (1, hidden_dim), jnp.float32, -bound1, bound1)
    w2 = jax.random.uniform(k3, (hidden_dim, action_dim), jnp.float32, -bound2, bound2)
    b2 = jax.random.uniform(k4, (1, action_dim), jnp.float32, -bound2, bound2)
    return w1, b1, w2, b2


if __name__ == "__main__":
    # Small demo shapes (amortize dispatch by batching many policy evaluations per call).
    batch, state_dim, hidden_dim, action_dim = 64, 4, 32, 8

    key = jax.random.PRNGKey(0)
    kx, kp = jax.random.split(key)
    x = jax.random.normal(kx, (batch, state_dim), jnp.float32)
    w1, b1, w2, b2 = init_params(kp, state_dim, hidden_dim, action_dim)
    params_blob, offsets = pack_params(w1, b1, w2, b2)

    probs = policy_net_forward(x, params_blob, offsets,
                               state_dim, hidden_dim, action_dim)
    probs = jax.block_until_ready(probs)

    # sanity check against plain-JAX reference
    h_ref = jnp.maximum(x @ w1 + b1, 0.0)
    logits_ref = h_ref @ w2 + b2
    probs_ref = jax.nn.softmax(logits_ref, axis=1)
    assert probs.shape == (batch, action_dim)
    # approx=True reciprocal -> allow ~1e-3-scale slack
    assert jnp.allclose(probs, probs_ref, atol=5e-3), "mismatch vs reference"
    assert jnp.allclose(jnp.sum(probs, axis=1), 1.0, atol=5e-3), "rows must sum to ~1"

    print("KERNEL_OK")
</pallas_src>

<mosaic_0001>
module attributes {stable_mosaic.version = 11 : i64} {
  func.func @policy_net_kernel(%arg0: i32, %arg1: memref<64x4xf32, #tpu.memory_space<vmem>>, %arg2: memref<56x32xf32, #tpu.memory_space<vmem>>, %arg3: memref<64x8xf32, #tpu.memory_space<vmem>>) attributes {dimension_semantics = [#tpu.dimension_semantics<parallel>], iteration_bounds = array<i64: 1>, scalar_prefetch = 0 : i64, scratch_operands = 0 : i64, tpu.core_type = #tpu.core_type<tc>, window_params = [{transform_indices = @transform_0, window_bounds = array<i64: 64, 4>}, {pipeline_mode = #tpu.pipeline_mode<synchronous>, transform_indices = @transform_1, window_bounds = array<i64: 56, 32>}, {transform_indices = @transform_2, window_bounds = array<i64: 64, 8>}]} {
    %c0 = arith.constant 0 : index
    %c0_0 = arith.constant 0 : index
    %0 = vector.load %arg1[%c0, %c0_0] : memref<64x4xf32, #tpu.memory_space<vmem>>, vector<64x4xf32>
    %c0_1 = arith.constant 0 : index
    %c0_2 = arith.constant 0 : index
    %1 = vector.load %arg2[%c0_1, %c0_2] : memref<56x32xf32, #tpu.memory_space<vmem>>, vector<4x32xf32>
    %c8 = arith.constant 8 : index
    %c0_3 = arith.constant 0 : index
    %2 = vector.load %arg2[%c8, %c0_3] : memref<56x32xf32, #tpu.memory_space<vmem>>, vector<1x32xf32>
    %c16 = arith.constant 16 : index
    %c0_4 = arith.constant 0 : index
    %3 = vector.load %arg2[%c16, %c0_4] : memref<56x32xf32, #tpu.memory_space<vmem>>, vector<32x8xf32>
    %c48 = arith.constant 48 : index
    %c0_5 = arith.constant 0 : index
    %4 = vector.load %arg2[%c48, %c0_5] : memref<56x32xf32, #tpu.memory_space<vmem>>, vector<1x8xf32>
    %cst = arith.constant dense<0.000000e+00> : vector<64x32xf32>
    %5 = tpu.matmul %0, %1, %cst {dimension_numbers = #tpu.dot_dimension_numbers<[1], [0], [0], [1], [0, 0, 1, 1], [], []>} : vector<64x4xf32>, vector<4x32xf32>, vector<64x32xf32> -> vector<64x32xf32>
    %6 = vector.broadcast %2 : vector<1x32xf32> to vector<64x32xf32>
    %7 = arith.addf %5, %6 : vector<64x32xf32>
    %cst_6 = arith.constant 0.000000e+00 : f32
    %8 = vector.broadcast %cst_6 : f32 to vector<64x32xf32>
    %9 = arith.maximumf %7, %8 : vector<64x32xf32>
    %cst_7 = arith.constant dense<0.000000e+00> : vector<64x8xf32>
    %10 = tpu.matmul %9, %3, %cst_7 {dimension_numbers = #tpu.dot_dimension_numbers<[1], [0], [0], [1], [0, 0, 1, 1], [], []>} : vector<64x32xf32>, vector<32x8xf32>, vector<64x8xf32> -> vector<64x8xf32>
    %11 = vector.broadcast %4 : vector<1x8xf32> to vector<64x8xf32>
    %12 = arith.addf %10, %11 : vector<64x8xf32>
    %cst_8 = arith.constant dense<0xFF800000> : vector<64xf32>
    %13 = vector.multi_reduction <maximumf>, %12, %cst_8 [1] : vector<64x8xf32> to vector<64xf32>
    %14 = vector.shape_cast %13 : vector<64xf32> to vector<64x1xf32>
    %15 = vector.broadcast %14 : vector<64x1xf32> to vector<64x8xf32>
    %16 = arith.subf %12, %15 : vector<64x8xf32>
    %17 = math.exp %16 : vector<64x8xf32>
    %cst_9 = arith.constant dense<0.000000e+00> : vector<64xf32>
    %18 = vector.multi_reduction <add>, %17, %cst_9 [1] : vector<64x8xf32> to vector<64xf32>
    %19 = vector.shape_cast %18 : vector<64xf32> to vector<64x1xf32>
    %20 = tpu.reciprocal %19 {approx = true} : vector<64x1xf32> -> vector<64x1xf32>
    %21 = vector.broadcast %20 : vector<64x1xf32> to vector<64x8xf32>
    %22 = arith.mulf %17, %21 : vector<64x8xf32>
    %c0_10 = arith.constant 0 : index
    %c0_11 = arith.constant 0 : index
    %23 = vector.load %arg3[%c0_10, %c0_11] : memref<64x8xf32, #tpu.memory_space<vmem>>, vector<64x8xf32>
    tpu.vector_store %arg3[%c0_10, %c0_11], %22 {strides = array<i32>} : memref<64x8xf32, #tpu.memory_space<vmem>>, vector<64x8xf32>,
    return
  }
  func.func @transform_0(%arg0: i32) -> (i32, i32) {
    %c0_i32 = arith.constant 0 : i32
    %c0_i32_0 = arith.constant 0 : i32
    return %arg0, %c0_i32 : i32, i32
  }
  func.func @transform_1(%arg0: i32) -> (i32, i32) {
    %c0_i32 = arith.constant 0 : i32
    %c0_i32_0 = arith.constant 0 : i32
    %c0_i32_1 = arith.constant 0 : i32
    return %c0_i32, %c0_i32_0 : i32, i32
  }
  func.func @transform_2(%arg0: i32) -> (i32, i32) {
    %c0_i32 = arith.constant 0 : i32
    %c0_i32_0 = arith.constant 0 : i32
    return %arg0, %c0_i32 : i32, i32
  }
}

</mosaic_0001>

<bundles_post_ra>
// kernel: tpu_custom_call.1
= control target key start
LH: loop header
LB: loop body
LE: loop exit
PB: predicated region body
PF: predicated region fallthrough
CT: control target
= control target key end

     0   :  { %vm55_vm0 = vcmask 1043456   ;;  %vm30_vm1 = vcmask 31744   ;;  %vm176_vm2 = vcmask 261120   ;;  %vm306_vm3 = vcmask 64512   ;;  %s645_s1 = inlined_call_operand.vmem [shape: f32[56,32], index: 1, kind: input, shape index: {}]   ;;  %s646_s0 = inlined_call_operand.vmem [shape: f32[64,4], index: 0, kind: input, shape index: {}]   ;;  %s647_s2 = inlined_call_operand.vmem [shape: f32[64,8], index: 2, kind: output, shape index: {}]  }
   0x1   :  { %v19_v0 = vld [vmem:[%s645_s1] sm:$0xf]  ;;  %v12_v2 = vld [vmem:[%s646_s0 + $0x8] sm:$0xff]  ;;  %v13_v3 = vld [vmem:[%s646_s0 + $0x10] sm:$0xff] }
   0x2   :  { %v11_v1 = vld [vmem:[%s646_s0] sm:$0xff]  ;;  %447 = vmatprep.subr.msk.mxu0 %vm55_vm0, %v19_v0  ;;  %v21_v4 = vld [vmem:[%s645_s1 + $0x10] sm:$0xff]  ;;  %v22_v5 = vld [vmem:[%s645_s1 + $0x18] sm:$0xff] }
   0x3   :  { %449 = vmatprep.mubr.msk.f32.mxu0 %vm30_vm1, %v11_v1  ;;  %448 = vmatpush3.msk.msra.mxu0 %vm55_vm0, %v19_v0  ;;  %v14_v6 = vld [vmem:[%s646_s0 + $0x18] sm:$0xff]  ;;  %v481_v7 = vpack.c.bf16 %v22_v5, %v21_v4  ;;  %v15_v8 = vld [vmem:[%s646_s0 + $0x20] sm:$0xff]  ;;  %v16_v9 = vld [vmem:[%s646_s0 + $0x28] sm:$0xff] }
   0x4   :  { %450 = vmatmul.mubr.msk.f32.vlgmr.msra.gmra.mrb[0].mxu0 %vm30_vm1, %v12_v2  ;;  %v17_v10 = vld [vmem:[%s646_s0 + $0x30] sm:$0xff]  ;;  %v18_v11 = vld [vmem:[%s646_s0 + $0x38] sm:$0xff]  ;;  %v23_v12 = vld [vmem:[%s645_s1 + $0x20] sm:$0xff] }
   0x5   :  { %452 = vmatprep.mubr.msk.f32.mxu0 %vm30_vm1, %v13_v3  ;;  %482 = vmatprep.subr.bf16.mxu1 %v481_v7  ;;  %v24_v13 = vld [vmem:[%s645_s1 + $0x28] sm:$0xff]  ;;  %v417_v40 = vld [vmem:[%s645_s1 + $0x30] ss:$0 sm:$0xff] }
   0x6   :  { %484 = vmatpush3.bf16.msra.mxu1 %v481_v7  ;;  %v485_v14 = vpack.c.bf16 %v24_v13, %v23_v12  ;;  %v407_v15 = vld [vmem:[%s645_s1 + $0x8] ss:$0 sm:$0xff] }
   0x8   :  { %453 = vmatmul.mubr.msk.f32.gmra.mrb[2].mxu0 %vm30_vm1, %v14_v6  ;;  %486 = vmatprep.subr.bf16.mxu1 %v485_v14 }
   0x9   :  { %455 = vmatprep.mubr.msk.f32.mxu0 %vm30_vm1, %v15_v8 }
   0xa   :  { %488 = vmatpush3.bf16.msra.mxu1 %v485_v14 }
   0xc   :  { %456 = vmatmul.mubr.msk.f32.gmra.mrb[4].mxu0 %vm30_vm1, %v16_v9 }
   0xd   :  { %458 = vmatprep.mubr.msk.f32.mxu0 %vm30_vm1, %v17_v10 }
  0x10   :  { %459 = vmatmul.mubr.msk.f32.gmra.mrb[6].mxu0 %vm30_vm1, %v18_v11 }
  0xd7   :  { %v451_v16 = vpop.f32.mrb[0].mxu0 }
  0xd8   :  { %v131_v17 = vadd.f32 %v451_v16, %v407_v15  ;;  %v125_v18 = vpop.f32.mrb[1].mxu0 }
  0xd9   :  { %v126_v19 = vadd.f32 %v407_v15, %v125_v18 }
  0xda   :  { %v165_v22 = vmax.f32 %v131_v17, 0.0 }
  0xdb   :  { %v164_v20 = vmax.f32 %v126_v19, 0.0  ;;  %v454_v21 = vpop.f32.mrb[2].mxu0 }
  0xdc   :  { %v141_v23 = vadd.f32 %v454_v21, %v407_v15  ;;  %v135_v24 = vpop.f32.mrb[3].mxu0 }
  0xdd   :  { %v136_v25 = vadd.f32 %v407_v15, %v135_v24  ;;  %469 = vmatprep.mubr.msk.f32.mxu1 %vm176_vm2, %v164_v20 }
  0xde   :  { %470 = vmatmul.mubr.msk.f32.vlgmr.msra.gmra.mrb[0].mxu1 %vm176_vm2, %v165_v22  ;;  %v167_v28 = vmax.f32 %v141_v23, 0.0 }
  0xdf   :  { %v166_v26 = vmax.f32 %v136_v25, 0.0  ;;  %v457_v27 = vpop.f32.mrb[4].mxu0 }
  0xe0   :  { %v151_v29 = vadd.f32 %v457_v27, %v407_v15  ;;  %v145_v30 = vpop.f32.mrb[5].mxu0 }
  0xe1   :  { %v146_v31 = vadd.f32 %v407_v15, %v145_v30  ;;  %472 = vmatprep.mubr.msk.f32.mxu1 %vm176_vm2, %v166_v26 }
  0xe2   :  { %v169_v32 = vmax.f32 %v151_v29, 0.0  ;;  %473 = vmatmul.mubr.msk.f32.gmra.mrb[2].mxu1 %vm176_vm2, %v167_v28 }
  0xe3   :  { %v168_v33 = vmax.f32 %v146_v31, 0.0  ;;  %v460_v34 = vpop.f32.mrb[6].mxu0 }
  0xe4   :  { %v161_v35 = vadd.f32 %v460_v34, %v407_v15  ;;  %v155_v36 = vpop.f32.mrb[7].mxu0 }
  0xe5   :  { %v156_v37 = vadd.f32 %v407_v15, %v155_v36  ;;  %475 = vmatprep.mubr.msk.f32.mxu1 %vm176_vm2, %v168_v33 }
  0xe6   :  { %v171_v38 = vmax.f32 %v161_v35, 0.0  ;;  %476 = vmatmul.mubr.msk.f32.gmra.mrb[4].mxu1 %vm176_vm2, %v169_v32 }
  0xe7   :  { %v170_v39 = vmax.f32 %v156_v37, 0.0 }
  0xe9   :  { %478 = vmatprep.mubr.msk.f32.mxu1 %vm176_vm2, %v170_v39 }
  0xea   :  { %479 = vmatmul.mubr.msk.f32.gmra.mrb[6].mxu1 %vm176_vm2, %v171_v38 }
 0x1b1   :  { %v471_v41 = vpop.f32.mrb[0].mxu1 }
 0x1b2   :  { %v273_v42 = vadd.f32 %v471_v41, %v417_v40  ;;  %v267_v43 = vpop.f32.mrb[1].mxu1 }
 0x1b3   :  { %v268_v44 = vadd.f32 %v417_v40, %v267_v43 }
 0x1b4   :  { %v310_v45 = vsel %vm306_vm3, %v273_v42, -inf }
 0x1b5   :  { %311 = vmax.xlane.f32.xlu0 %v310_v45  ;;  %v474_v46 = vpop.f32.mrb[2].mxu1  ;;  %v307_v51 = vsel %vm306_vm3, %v268_v44, -inf }
 0x1b6   :  { %v283_v47 = vadd.f32 %v474_v46, %v417_v40  ;;  %v277_v48 = vpop.f32.mrb[3].mxu1 }
 0x1b7   :  { %v278_v49 = vadd.f32 %v417_v40, %v277_v48 }
 0x1b8   :  { %v316_v50 = vsel %vm306_vm3, %v283_v47, -inf }
 0x1b9   :  { %317 = vmax.xlane.f32.xlu1 %v316_v50  ;;  %v477_v52 = vpop.f32.mrb[4].mxu1  ;;  %308 = vmax.xlane.f32.xlu0 %v307_v51  ;;  %v313_v56 = vsel %vm306_vm3, %v278_v49, -inf }
 0x1ba   :  { %v287_v53 = vpop.f32.mrb[5].mxu1  ;;  %v293_v55 = vadd.f32 %v477_v52, %v417_v40 }
 0x1bb   :  { %v288_v54 = vadd.f32 %v417_v40, %v287_v53 }
 0x1bc   :  { %v322_v62 = vsel %vm306_vm3, %v293_v55, -inf }
 0x1bd   :  { %v480_v57 = vpop.f32.mrb[6].mxu1  ;;  %314 = vmax.xlane.f32.xlu1 %v313_v56  ;;  %v319_v58 = vsel %vm306_vm3, %v288_v54, -inf }
 0x1be   :  { %v297_v59 = vpop.f32.mrb[7].mxu1  ;;  %320 = vmax.xlane.f32.xlu0 %v319_v58  ;;  %v303_v61 = vadd.f32 %v480_v57, %v417_v40 }
 0x1bf   :  { %v298_v60 = vadd.f32 %v417_v40, %v297_v59 }
 0x1c0   :  { %v328_v0 = vsel %vm306_vm3, %v303_v61, -inf }
 0x1c1   :  { %323 = vmax.xlane.f32.xlu1 %v322_v62  ;;  %v325_v63 = vsel %vm306_vm3, %v298_v60, -inf }
 0x1c2   :  { %326 = vmax.xlane.f32.xlu0 %v325_v63 }
 0x1c5   :  { %329 = vmax.xlane.f32.xlu1 %v328_v0 }
 0x242   :  { %v312_v1 = vpop.xlane.xlu0 %311 }
 0x243   :  { %v332_v2 = vsub.f32 %v273_v42, %v312_v1 }
 0x245   :  { %v341_v3 = vmul.f32 1.442695, %v332_v2 }
 0x246   :  { %v318_v4 = vpop.xlane.xlu1 %317  ;;  %v309_v5 = vpop.xlane.xlu0 %308 }
 0x247   :  { %489 = vpow2.f32 %v341_v3  ;;  %v334_v6 = vsub.f32 %v283_v47, %v318_v4  ;;  %v331_v7 = vsub.f32 %v268_v44, %v309_v5 }
 0x249   :  { %v345_v8 = vmul.f32 1.442695, %v334_v6  ;;  %v339_v9 = vmul.f32 1.442695, %v331_v7 }
 0x24a   :  { %v315_v10 = vpop.xlane.xlu1 %314 }
 0x24b   :  { %491 = vpow2.f32 %v345_v8  ;;  %v333_v11 = vsub.f32 %v278_v49, %v315_v10  ;;  %v321_v12 = vpop.xlane.xlu0 %320 }
 0x24c   :  { %493 = vpow2.f32 %v339_v9  ;;  %v335_v13 = vsub.f32 %v288_v54, %v321_v12 }
 0x24d   :  { %v343_v14 = vmul.f32 1.442695, %v333_v11 }
 0x24e   :  { %v347_v15 = vmul.f32 1.442695, %v335_v13  ;;  %v324_v16 = vpop.xlane.xlu1 %323 }
 0x24f   :  { %495 = vpow2.f32 %v343_v14  ;;  %v336_v17 = vsub.f32 %v293_v55, %v324_v16  ;;  %v327_v18 = vpop.xlane.xlu0 %326 }
 0x250   :  { %v337_v19 = vsub.f32 %v298_v60, %v327_v18  ;;  %497 = vpow2.f32 %v347_v15 }
 0x251   :  { %v490_v20 = vpop.eup %489  ;;  %v349_v21 = vmul.f32 1.442695, %v336_v17 }
 0x252   :  { %v351_v22 = vmul.f32 1.442695, %v337_v19  ;;  %v330_v23 = vpop.xlane.xlu1 %329  ;;  %v358_v24 = vsel %vm306_vm3, %v490_v20, 0.0 }
 0x253   :  { %499 = vpow2.f32 %v349_v21  ;;  %v338_v25 = vsub.f32 %v303_v61, %v330_v23  ;;  %359 = vadd.xlane.f32.xlu1 %v358_v24 }
 0x254   :  { %501 = vpow2.f32 %v351_v22 }
 0x255   :  { %v492_v26 = vpop.eup %491  ;;  %v353_v27 = vmul.f32 1.442695, %v338_v25 }
 0x256   :  { %v494_v28 = vpop.eup %493  ;;  %v364_v29 = vsel %vm306_vm3, %v492_v26, 0.0 }
 0x257   :  { %503 = vpow2.f32 %v353_v27  ;;  %365 = vadd.xlane.f32.xlu1 %v364_v29  ;;  %v355_v30 = vsel %vm306_vm3, %v494_v28, 0.0 }
 0x258   :  { %356 = vadd.xlane.f32.xlu0 %v355_v30 }
 0x259   :  { %v496_v31 = vpop.eup %495 }
 0x25a   :  { %v361_v32 = vsel %vm306_vm3, %v496_v31, 0.0  ;;  %v498_v33 = vpop.eup %497 }
 0x25b   :  { %v367_v36 = vsel %vm306_vm3, %v498_v33, 0.0 }
 0x25c   :  { %362 = vadd.xlane.f32.xlu0 %v361_v32 }
 0x25d   :  { %v500_v34 = vpop.eup %499 }
 0x25e   :  { %v370_v35 = vsel %vm306_vm3, %v500_v34, 0.0  ;;  %v502_v37 = vpop.eup %501 }
 0x25f   :  { %371 = vadd.xlane.f32.xlu1 %v370_v35  ;;  %v373_v40 = vsel %vm306_vm3, %v502_v37, 0.0 }
 0x260   :  { %368 = vadd.xlane.f32.xlu0 %v367_v36 }
 0x261   :  { %v504_v38 = vpop.eup %503 }
 0x262   :  { %v376_v39 = vsel %vm306_vm3, %v504_v38, 0.0 }
 0x263   :  { %377 = vadd.xlane.f32.xlu1 %v376_v39 }
 0x264   :  { %374 = vadd.xlane.f32.xlu0 %v373_v40 }
 0x2e0   :  { %v360_v41 = vpop.xlane.xlu1 %359 }
 0x2e1   :  { %505 = vrcp.f32 %v360_v41 }
 0x2e4   :  { %v366_v42 = vpop.xlane.xlu1 %365 }
 0x2e5   :  { %507 = vrcp.f32 %v366_v42  ;;  %v357_v43 = vpop.xlane.xlu0 %356 }
 0x2e6   :  { %509 = vrcp.f32 %v357_v43 }
 0x2e9   :  { %v363_v44 = vpop.xlane.xlu0 %362 }
 0x2ea   :  { %511 = vrcp.f32 %v363_v44 }
 0x2eb   :  { %v506_v45 = vpop.eup %505 }
 0x2ec   :  { %v388_v46 = vmul.f32 %v506_v45, %v490_v20  ;;  %v372_v47 = vpop.xlane.xlu1 %371 }
 0x2ed   :  { %513 = vrcp.f32 %v372_v47  ;;  %v369_v48 = vpop.xlane.xlu0 %368 }
 0x2ee   :  { %396 = vst.msk [vmem:[%s647_s2 + $0x8] sm:$0xff] %vm306_vm3, %v388_v46  ;;  %515 = vrcp.f32 %v369_v48 }
 0x2ef   :  { %v508_v49 = vpop.eup %507 }
 0x2f0   :  { %v510_v50 = vpop.eup %509  ;;  %v390_v51 = vmul.f32 %v508_v49, %v492_v26  ;;  %v378_v52 = vpop.xlane.xlu1 %377 }
 0x2f1   :  { %v387_v53 = vmul.f32 %v510_v50, %v494_v28  ;;  %517 = vrcp.f32 %v378_v52  ;;  %v375_v54 = vpop.xlane.xlu0 %374 }
 0x2f2   :  { %398 = vst.msk [vmem:[%s647_s2 + $0x18] sm:$0xff] %vm306_vm3, %v390_v51  ;;  %519 = vrcp.f32 %v375_v54 }
 0x2f3   :  { %395 = vst.msk [vmem:[%s647_s2] sm:$0xff] %vm306_vm3, %v387_v53 }
 0x2f4   :  { %v512_v55 = vpop.eup %511 }
 0x2f5   :  { %v389_v56 = vmul.f32 %v512_v55, %v496_v31 }
 0x2f7   :  { %v514_v57 = vpop.eup %513  ;;  %397 = vst.msk [vmem:[%s647_s2 + $0x10] sm:$0xff] %vm306_vm3, %v389_v56 }
 0x2f8   :  { %v516_v58 = vpop.eup %515  ;;  %v392_v59 = vmul.f32 %v514_v57, %v500_v34 }
 0x2f9   :  { %v391_v60 = vmul.f32 %v516_v58, %v498_v33 }
 0x2fa   :  { %400 = vst.msk [vmem:[%s647_s2 + $0x28] sm:$0xff] %vm306_vm3, %v392_v59 }
 0x2fb   :  { %v518_v61 = vpop.eup %517  ;;  %399 = vst.msk [vmem:[%s647_s2 + $0x20] sm:$0xff] %vm306_vm3, %v391_v60 }
 0x2fc   :  { %v520_v62 = vpop.eup %519  ;;  %v394_v63 = vmul.f32 %v518_v61, %v504_v38 }
 0x2fd   :  { %v393_v0 = vmul.f32 %v520_v62, %v502_v37 }
 0x2fe   :  { %402 = vst.msk [vmem:[%s647_s2 + $0x38] sm:$0xff] %vm306_vm3, %v394_v63 }
 0x2ff   :  { %401 = vst.msk [vmem:[%s647_s2 + $0x30] sm:$0xff] %vm306_vm3, %v393_v0 }

</bundles_post_ra>
